<compile_context>
chip_gen: v5e
topology: v5e:2x2
jax: 0.10.0
libtpu: 0.0.40
codegen_flags: <defaults>
</compile_context>

<pallas_src>
import jax
import jax.numpy as jnp
import jax.scipy.linalg
from jax.experimental import pallas as pl
from jax.experimental.pallas import tpu as pltpu

# ---------------------------------------------------------------------------
# Problem sizes (small, consistent with the COVGPNN module's forward).
# ---------------------------------------------------------------------------
B = 8       # batch
C = 5       # input state channels
S = 10      # sequence length
F = C * S   # flattened input features
H = 32      # encoder hidden width
D = 8       # latent (deep-kernel feature) dim
M = 16      # inducing points per task
T = 3       # GP output tasks
TM = T * M          # 48  (all tasks packed along lanes)
DC = D + TM         # 56  (packed [feat | cross] width)
T2 = 2 * T          # 6   (packed [mean | q] / [mean | std] width)
TM2 = 2 * TM        # 96

JITTER = 1e-4

# ---- parameter-slab layout: one (SLAB_ROWS, 128) f32 slab, 8-aligned offsets ----
LANES = 128
# rows 0..7  : packed (1, .) rows -> 0:b1  1:bcat  2:z2  3:1/ls^2  4:outputscale
W1_OFF = 8          # rows   8.. 57 : w1      (F, H)
W2C_OFF = 64        # rows  64.. 95 : W2cat   (H, D+TM)
CMAT_OFF = 96       # rows  96..143 : cmat_bd (TM, TM)  (block-diagonal, osc^2 folded)
S2_OFF = 144        # rows 144..239 : S2      (2TM, 2T) (block_diag(alpha*sel, sel))
SLAB_ROWS = 240


# ---------------------------------------------------------------------------
# Pallas kernel: single invocation, all tasks fused, 4 MXU ops total.
# ---------------------------------------------------------------------------
def covgp_kernel(x_ref, slab_ref, out_ref):
    # ---- shared encoder MLP (computed once for all tasks) ----
    x = x_ref[...]                                                     # (B, F)
    w1 = slab_ref[W1_OFF:W1_OFF + F, 0:H]                              # (F, H)
    b1 = slab_ref[0:1, 0:H]                                            # (1, H)
    h = jnp.tanh(jnp.dot(x, w1, preferred_element_type=jnp.float32) + b1)

    # ---- fused [feat | cross] head:  fc = h @ [w2 | w2@zsp] + [b2 | b2@zsp] ----
    w2c = slab_ref[W2C_OFF:W2C_OFF + H, 0:DC]                          # (H, D+TM)
    b2c = slab_ref[1:2, 0:DC]                                          # (1, D+TM)
    fc = jnp.dot(h, w2c, preferred_element_type=jnp.float32) + b2c     # (B, D+TM)
    feat = fc[:, :D]                                                   # (B, D)
    cross = fc[:, D:]                                                  # (B, TM) = feat @ (z/ls^2)

    # ---- fused per-task RBF cross-kernel (unscaled; outputscale folded later) ----
    f2 = jnp.sum(feat * feat, axis=1, keepdims=True)                   # (B, 1)
    z2 = slab_ref[2:3, 0:TM]                                           # (1, TM) |z/ls|^2
    ils2 = slab_ref[3:4, 0:TM]                                         # (1, TM) 1/ls^2
    sqd = jnp.maximum(f2 * ils2 + z2 - 2.0 * cross, 0.0)
    e = jnp.exp(-0.5 * sqd)                                            # (B, TM)

    # ---- SVGP latent predictive mean / variance (osc folded into alpha / cmat) ----
    cmat = slab_ref[CMAT_OFF:CMAT_OFF + TM, 0:TM]                      # (TM, TM)
    kc = jnp.dot(e, cmat, preferred_element_type=jnp.float32)          # (B, TM)
    s2 = slab_ref[S2_OFF:S2_OFF + TM2, 0:T2]                           # (2TM, 2T)
    mq = jnp.dot(jnp.concatenate([e, kc * e], axis=1), s2,
                 preferred_element_type=jnp.float32)                   # (B, 2T) = [mean | q]
    mean = mq[:, :T]
    q = mq[:, T:]

    oscv = slab_ref[4:5, 0:T]                                          # (1, T) k(x,x) diag
    std = jnp.sqrt(jnp.maximum(q + oscv, 1e-12))

    out_ref[...] = jnp.concatenate([mean, std], axis=1)                # (B, 2T)


# ---------------------------------------------------------------------------
# Parameter construction (deterministic, synthetic).
# ---------------------------------------------------------------------------
def make_params(key):
    ks = jax.random.split(key, 8)
    w1 = 0.2 * jax.random.normal(ks[0], (F, H), jnp.float32)
    b1 = 0.1 * jax.random.normal(ks[1], (1, H), jnp.float32)
    w2 = 0.2 * jax.random.normal(ks[2], (H, D), jnp.float32)
    b2 = 0.1 * jax.random.normal(ks[3], (1, D), jnp.float32)

    z_ind = 0.5 * jax.random.normal(ks[4], (T, M, D), jnp.float32)      # inducing points
    m_var = 0.5 * jax.random.normal(ks[5], (T, M), jnp.float32)         # variational mean
    l_raw = 0.1 * jax.random.normal(ks[6], (T, M, M), jnp.float32)
    tri = jnp.tril(l_raw, -1) + 0.3 * jnp.eye(M, dtype=jnp.float32)[None]
    s_var = jnp.einsum("tij,tkj->tik", tri, tri)                        # variational covar (PSD)

    lengthscale = 1.0 + 0.1 * jnp.arange(T, dtype=jnp.float32)
    outputscale = 0.5 + 0.1 * jnp.arange(T, dtype=jnp.float32)
    return dict(w1=w1, b1=b1, w2=w2, b2=b2, z_ind=z_ind, m_var=m_var,
                s_var=s_var, lengthscale=lengthscale, outputscale=outputscale)


def prepare_gp_inputs(params):
    """Parameter-only GP pre-products + slab packing. Runs ONCE (outside hot path).

    Returns a single (SLAB_ROWS, 128) f32 slab holding every constant the kernel needs.
    """
    z, m_var, s_var = params["z_ind"], params["m_var"], params["s_var"]
    ls, osc = params["lengthscale"], params["outputscale"]

    inv_ls = 1.0 / ls                                                   # (T,)
    zs = z * inv_ls[:, None, None]                                      # (T, M, D)  z / ls
    z2 = jnp.sum(zs * zs, axis=-1)                                      # (T, M)

    # Batched Kzz and its inverse via one batched linear solve for all T tasks.
    sq = jnp.maximum(
        z2[:, :, None] + z2[:, None, :]
        - 2.0 * jnp.einsum("tmd,tnd->tmn", zs, zs), 0.0)
    kzz = (osc[:, None, None] * jnp.exp(-0.5 * sq)
           + JITTER * jnp.eye(M, dtype=jnp.float32)[None])
    eye_b = jnp.broadcast_to(jnp.eye(M, dtype=jnp.float32), (T, M, M))
    a = jnp.linalg.solve(kzz, eye_b)                                    # (T, M, M) = Kzz^{-1}

    alpha = jnp.einsum("tmn,tn->tm", a, m_var)                          # (T, M)   Kzz^{-1} m
    cmat = jnp.einsum("tij,tjk,tkl->til", a, s_var, a) - a              # (T, M, M)

    # Fold outputscale into alpha / cmat so the kernel uses the unscaled RBF exp().
    alpha_sc = (alpha * osc[:, None]).reshape(TM)                       # (TM,)
    cmat_sc = cmat * (osc ** 2)[:, None, None]
    cmat_bd = jax.scipy.linalg.block_diag(*[cmat_sc[t] for t in range(T)])  # (TM, TM)

    # Fused encoder tail: [feat | cross] = h @ [w2 | w2 @ zsp] + [b2 | b2 @ zsp].
    zsp = z * (inv_ls ** 2)[:, None, None]                              # (T, M, D)  z / ls^2
    zsp_packed = jnp.transpose(zsp, (2, 0, 1)).reshape(D, TM)           # (D, TM)
    w2, b2 = params["w2"], params["b2"]
    w2cat = jnp.concatenate([w2, w2 @ zsp_packed], axis=1)              # (H, D+TM)
    bcat = jnp.concatenate([b2, b2 @ zsp_packed], axis=1)               # (1, D+TM)

    # Fused [mean | q] contraction: S2 = block_diag(alpha*sel, sel).
    sel = jnp.repeat(jnp.eye(T, dtype=jnp.float32), M, axis=0)          # (TM, T)
    s2 = jax.scipy.linalg.block_diag(alpha_sc[:, None] * sel, sel)      # (2TM, 2T)

    # ---- pack everything into a single (SLAB_ROWS, 128) slab -> 1 input DMA ----
    slab = jnp.zeros((SLAB_ROWS, LANES), jnp.float32)
    slab = slab.at[0, 0:H].set(params["b1"][0])
    slab = slab.at[1, 0:DC].set(bcat[0])
    slab = slab.at[2, 0:TM].set(z2.reshape(TM))
    slab = slab.at[3, 0:TM].set(jnp.repeat(inv_ls ** 2, M))
    slab = slab.at[4, 0:T].set(osc)
    slab = slab.at[W1_OFF:W1_OFF + F, 0:H].set(params["w1"])
    slab = slab.at[W2C_OFF:W2C_OFF + H, 0:DC].set(w2cat)
    slab = slab.at[CMAT_OFF:CMAT_OFF + TM, 0:TM].set(cmat_bd)
    slab = slab.at[S2_OFF:S2_OFF + TM2, 0:T2].set(s2)
    return slab.astype(jnp.float32)


# ---------------------------------------------------------------------------
# Wrapper == COVGPNNModelWrapper.forward: returns (mean, stddev), each (B, T).
# Takes x already flattened to (B, F); flatten where the data is produced.
# ---------------------------------------------------------------------------
@jax.jit
def covgpnn_wrapper_forward(xf, slab):
    vmem = pl.BlockSpec(memory_space=pltpu.MemorySpace.VMEM)
    out = pl.pallas_call(
        covgp_kernel,
        out_shape=jax.ShapeDtypeStruct((B, T2), jnp.float32),
        in_specs=[vmem, vmem],
        out_specs=vmem,
    )(xf, slab)
    return out[:, :T], out[:, T:]


# ---------------------------------------------------------------------------
# Pure-JAX reference for verification (per-task loop, latent distribution).
# ---------------------------------------------------------------------------
def reference_forward(x, params):
    xf = x.reshape(B, F).astype(jnp.float32)
    h = jnp.tanh(xf @ params["w1"] + params["b1"])
    feat = h @ params["w2"] + params["b2"]

    def sqdist(a, b):
        a2 = jnp.sum(a * a, axis=-1, keepdims=True)
        b2 = jnp.sum(b * b, axis=-1, keepdims=True)
        return jnp.maximum(a2 + b2.T - 2.0 * a @ b.T, 0.0)

    means, stds = [], []
    for t in range(T):
        ls = params["lengthscale"][t]
        osc = params["outputscale"][t]
        zt = params["z_ind"][t] / ls
        ft = feat / ls
        kxz = osc * jnp.exp(-0.5 * sqdist(ft, zt))
        kzz = osc * jnp.exp(-0.5 * sqdist(zt, zt)) + JITTER * jnp.eye(M, dtype=jnp.float32)
        a_inv = jnp.linalg.solve(kzz, jnp.eye(M, dtype=jnp.float32))
        mean = kxz @ (a_inv @ params["m_var"][t])
        cmat = a_inv @ params["s_var"][t] @ a_inv - a_inv
        var = osc + jnp.sum((kxz @ cmat) * kxz, axis=1)
        means.append(mean)
        stds.append(jnp.sqrt(jnp.maximum(var, 1e-12)))
    return jnp.stack(means, axis=1), jnp.stack(stds, axis=1)


if __name__ == "__main__":
    key = jax.random.PRNGKey(0)
    kx, kp = jax.random.split(key)
    x = jax.random.normal(kx, (B, C, S), jnp.float32)   # NCW layout, like PyTorch conv1d input
    params = make_params(kp)

    # Parameter-only pre-products packed into one slab, once, outside the hot path.
    slab = prepare_gp_inputs(params)
    xf = x.reshape(B, F)                                 # flatten where the data is produced

    mean, std = covgpnn_wrapper_forward(xf, slab)
    jax.block_until_ready((mean, std))

    ref_mean, ref_std = reference_forward(x, params)
    assert mean.shape == (B, T) and std.shape == (B, T)
    assert jnp.allclose(mean, ref_mean, atol=5e-4, rtol=5e-4), "mean mismatch"
    assert jnp.allclose(std, ref_std, atol=5e-4, rtol=5e-4), "stddev mismatch"

    print("KERNEL_OK")
</pallas_src>

<mosaic_0001>
module attributes {stable_mosaic.version = 11 : i64} {
  func.func @covgp_kernel(%arg0: memref<8x50xf32, #tpu.memory_space<vmem>>, %arg1: memref<240x128xf32, #tpu.memory_space<vmem>>, %arg2: memref<8x6xf32, #tpu.memory_space<vmem>>) attributes {dimension_semantics = [], scalar_prefetch = 0 : i64, scratch_operands = 0 : i64, tpu.core_type = #tpu.core_type<tc>} {
    %c0 = arith.constant 0 : index
    %c0_0 = arith.constant 0 : index
    %0 = vector.load %arg0[%c0, %c0_0] : memref<8x50xf32, #tpu.memory_space<vmem>>, vector<8x50xf32>
    %c8 = arith.constant 8 : index
    %c0_1 = arith.constant 0 : index
    %1 = vector.load %arg1[%c8, %c0_1] : memref<240x128xf32, #tpu.memory_space<vmem>>, vector<50x32xf32>
    %c0_2 = arith.constant 0 : index
    %c0_3 = arith.constant 0 : index
    %2 = vector.load %arg1[%c0_2, %c0_3] : memref<240x128xf32, #tpu.memory_space<vmem>>, vector<1x32xf32>
    %cst = arith.constant dense<0.000000e+00> : vector<8x32xf32>
    %3 = tpu.matmul %0, %1, %cst {dimension_numbers = #tpu.dot_dimension_numbers<[1], [0], [0], [1], [0, 0, 1, 1], [], []>} : vector<8x50xf32>, vector<50x32xf32>, vector<8x32xf32> -> vector<8x32xf32>
    %4 = vector.broadcast %2 : vector<1x32xf32> to vector<8x32xf32>
    %5 = arith.addf %3, %4 : vector<8x32xf32>
    %6 = math.tanh %5 : vector<8x32xf32>
    %c64 = arith.constant 64 : index
    %c0_4 = arith.constant 0 : index
    %7 = vector.load %arg1[%c64, %c0_4] : memref<240x128xf32, #tpu.memory_space<vmem>>, vector<32x56xf32>
    %c1 = arith.constant 1 : index
    %c0_5 = arith.constant 0 : index
    %8 = vector.load %arg1[%c1, %c0_5] : memref<240x128xf32, #tpu.memory_space<vmem>>, vector<1x56xf32>
    %cst_6 = arith.constant dense<0.000000e+00> : vector<8x56xf32>
    %9 = tpu.matmul %6, %7, %cst_6 {dimension_numbers = #tpu.dot_dimension_numbers<[1], [0], [0], [1], [0, 0, 1, 1], [], []>} : vector<8x32xf32>, vector<32x56xf32>, vector<8x56xf32> -> vector<8x56xf32>
    %10 = vector.broadcast %8 : vector<1x56xf32> to vector<8x56xf32>
    %11 = arith.addf %9, %10 : vector<8x56xf32>
    %12 = vector.extract_strided_slice %11 {offsets = [0, 0], sizes = [8, 8], strides = [1, 1]} : vector<8x56xf32> to vector<8x8xf32>
    %13 = vector.extract_strided_slice %11 {offsets = [0, 8], sizes = [8, 48], strides = [1, 1]} : vector<8x56xf32> to vector<8x48xf32>
    %14 = arith.mulf %12, %12 : vector<8x8xf32>
    %cst_7 = arith.constant dense<0.000000e+00> : vector<8xf32>
    %15 = vector.multi_reduction <add>, %14, %cst_7 [1] : vector<8x8xf32> to vector<8xf32>
    %16 = vector.shape_cast %15 : vector<8xf32> to vector<8x1xf32>
    %c2 = arith.constant 2 : index
    %c0_8 = arith.constant 0 : index
    %17 = vector.load %arg1[%c2, %c0_8] : memref<240x128xf32, #tpu.memory_space<vmem>>, vector<1x48xf32>
    %c3 = arith.constant 3 : index
    %c0_9 = arith.constant 0 : index
    %18 = vector.load %arg1[%c3, %c0_9] : memref<240x128xf32, #tpu.memory_space<vmem>>, vector<1x48xf32>
    %19 = vector.broadcast %16 : vector<8x1xf32> to vector<8x48xf32>
    %20 = vector.broadcast %18 : vector<1x48xf32> to vector<8x48xf32>
    %21 = arith.mulf %19, %20 : vector<8x48xf32>
    %22 = vector.broadcast %17 : vector<1x48xf32> to vector<8x48xf32>
    %23 = arith.addf %21, %22 : vector<8x48xf32>
    %cst_10 = arith.constant 2.000000e+00 : f32
    %24 = vector.broadcast %cst_10 : f32 to vector<8x48xf32>
    %25 = arith.mulf %24, %13 : vector<8x48xf32>
    %26 = arith.subf %23, %25 : vector<8x48xf32>
    %cst_11 = arith.constant 0.000000e+00 : f32
    %27 = vector.broadcast %cst_11 : f32 to vector<8x48xf32>
    %28 = arith.maximumf %26, %27 : vector<8x48xf32>
    %cst_12 = arith.constant -5.000000e-01 : f32
    %29 = vector.broadcast %cst_12 : f32 to vector<8x48xf32>
    %30 = arith.mulf %29, %28 : vector<8x48xf32>
    %31 = math.exp %30 : vector<8x48xf32>
    %c96 = arith.constant 96 : index
    %c0_13 = arith.constant 0 : index
    %32 = vector.load %arg1[%c96, %c0_13] : memref<240x128xf32, #tpu.memory_space<vmem>>, vector<48x48xf32>
    %cst_14 = arith.constant dense<0.000000e+00> : vector<8x48xf32>
    %33 = tpu.matmul %31, %32, %cst_14 {dimension_numbers = #tpu.dot_dimension_numbers<[1], [0], [0], [1], [0, 0, 1, 1], [], []>} : vector<8x48xf32>, vector<48x48xf32>, vector<8x48xf32> -> vector<8x48xf32>
    %c144 = arith.constant 144 : index
    %c0_15 = arith.constant 0 : index
    %34 = vector.load %arg1[%c144, %c0_15] : memref<240x128xf32, #tpu.memory_space<vmem>>, vector<96x6xf32>
    %35 = arith.mulf %33, %31 : vector<8x48xf32>
    %36 = tpu.concatenate %31, %35 in 1 : vector<8x48xf32>, vector<8x48xf32> -> vector<8x96xf32>
    %cst_16 = arith.constant dense<0.000000e+00> : vector<8x6xf32>
    %37 = tpu.matmul %36, %34, %cst_16 {dimension_numbers = #tpu.dot_dimension_numbers<[1], [0], [0], [1], [0, 0, 1, 1], [], []>} : vector<8x96xf32>, vector<96x6xf32>, vector<8x6xf32> -> vector<8x6xf32>
    %38 = vector.extract_strided_slice %37 {offsets = [0, 0], sizes = [8, 3], strides = [1, 1]} : vector<8x6xf32> to vector<8x3xf32>
    %39 = vector.extract_strided_slice %37 {offsets = [0, 3], sizes = [8, 3], strides = [1, 1]} : vector<8x6xf32> to vector<8x3xf32>
    %c4 = arith.constant 4 : index
    %c0_17 = arith.constant 0 : index
    %40 = vector.load %arg1[%c4, %c0_17] : memref<240x128xf32, #tpu.memory_space<vmem>>, vector<1x3xf32>
    %41 = vector.broadcast %40 : vector<1x3xf32> to vector<8x3xf32>
    %42 = arith.addf %39, %41 : vector<8x3xf32>
    %cst_18 = arith.constant 9.99999996E-13 : f32
    %43 = vector.broadcast %cst_18 : f32 to vector<8x3xf32>
    %44 = arith.maximumf %42, %43 : vector<8x3xf32>
    %45 = math.sqrt %44 : vector<8x3xf32>
    %46 = tpu.concatenate %38, %45 in 1 : vector<8x3xf32>, vector<8x3xf32> -> vector<8x6xf32>
    %c0_19 = arith.constant 0 : index
    %c0_20 = arith.constant 0 : index
    %47 = vector.load %arg2[%c0_19, %c0_20] : memref<8x6xf32, #tpu.memory_space<vmem>>, vector<8x6xf32>
    tpu.vector_store %arg2[%c0_19, %c0_20], %46 {strides = array<i32>} : memref<8x6xf32, #tpu.memory_space<vmem>>, vector<8x6xf32>,
    return
  }
}

</mosaic_0001>

<bundles_post_ra>
// kernel: covgpnn_wrapper_forward.1
= control target key start
LH: loop header
LB: loop body
LE: loop exit
PB: predicated region body
PF: predicated region fallthrough
CT: control target
= control target key end

     0   :  { %7 = vsyncpa [#allocation3], 0  ;;  %s341_s0 = inlined_call_operand.hbm [shape: f32[8,50], index: 0, kind: input, shape index: {}]   ;;  %s342_s1 = inlined_call_operand.hbm [shape: f32[240,128], index: 1, kind: input, shape index: {}]   ;;  %s343_s2 = inlined_call_operand.vmem [shape: f32[8,6], index: 2, kind: output, shape index: {}]  }
   0x1   :  { %s14_s11 = sshll.u32 %s341_s0, 4  ;;  %s15_s11 = int_to_ptr.hbm [resolvable:$true] %s14_s11 }
   0x2   :  { %8 = vsyncpa [#allocation5], 0  ;;  %s308_s12 = smov [#allocation2]   ;;  %s24_s16 = sshll.u32 %s342_s1, 4  ;;  %s25_s16 = int_to_ptr.hbm [resolvable:$true] %s24_s16 }
   0x3   :  { %s16_s13 = sshll.u32 %s308_s12, 4  ;;  %s309_s17 = smov [#allocation4]   ;;  %s17_s13 = int_to_ptr.vmem [resolvable:$true] %s16_s13 }
   0x4   :  { %19 = dma.hbm_to_vmem [thread:$0]  %s15_s11, 128, %s17_s13, [#allocation3]  }
   0x5   :  { %s26_s18 = sshll.u32 %s309_s17, 4  ;;  %s310_s19 = smov 128   ;;  %s27_s18 = int_to_ptr.vmem [resolvable:$true] %s26_s18 }
   0x6   :  { %s311_s20 = smov 8  }
   0x7   :  { %32 = dma.hbm_to_vmem [thread:$0]  %s25_s16, 3840, %s27_s18, [#allocation5], %s310_s19, %s310_s19, %s311_s20  }
   0x8   :  { %304 = dma.done.wait [#allocation3], 128  }
   0x9   :  { %305 = vsyncadd [#allocation3], 4294967168 }
   0xa   :  { %306 = dma.done.wait [#allocation5], 3840  }
   0xb   :  { %307 = vsyncadd [#allocation5], 4294963456  ;;  %vm55_vm0 = vcmask 1041408   ;;  %v48_v0 = vld [vmem:[#allocation4 + $0x38] sm:$0x3]  ;;  %v47_v1 = vld [vmem:[#allocation4 + $0x30] sm:$0xff] }
   0xc   :  { %233 = vmatpush.msk.msra.mxu0 %vm55_vm0, %v48_v0  ;;  %v46_v2 = vld [vmem:[#allocation4 + $0x28] sm:$0xff]  ;;  %v45_v3 = vld [vmem:[#allocation4 + $0x20] sm:$0xff]  ;;  %v44_v4 = vld [vmem:[#allocation4 + $0x18] sm:$0xff]  ;;  %vm51_vm1 = vcmask 408576   ;;  %vm86_vm2 = vcmask 261120   ;;  %vm111_vm3 = vcmask 64512  }
   0xd   :  { %v43_v5 = vld [vmem:[#allocation4 + $0x10] sm:$0xff]  ;;  %v42_v6 = vld [vmem:[#allocation4 + $0x8] sm:$0xff]  ;;  %v41_v7 = vld [vmem:[#allocation2] sm:$0xff]  ;;  %s312_s0 = smov 120   ;;  %vm137_vm4 = vcmask 392192   ;;  %s313_s1 = smov 48  }
   0xe   :  { %69 = vmatpush.msra.mxu0 %v47_v1  ;;  %v83_v8 = vld [vmem:[#allocation4 + $0x58] sm:$0xff]  ;;  %v82_v9 = vld [vmem:[#allocation4 + $0x50] sm:$0xff]  ;;  %v81_v10 = vld [vmem:[#allocation4 + $0x48] sm:$0xff]  ;;  %s314_s21 = smov 3   ;;  %vm179_vm5 = vcmask 785408   ;;  %vm223_vm6 = vcmask 23552  }
   0xf   :  { %102 = vmatpush.msra.mxu1 %v83_v8  ;;  %v80_v11 = vld [vmem:[#allocation4 + $0x40] sm:$0xff]  ;;  %v136_v22 = vld [vmem:[#allocation4 + $0x88] sm:$0xff]  ;;  %v134_v24 = vld [vmem:[#allocation4 + $0x78] sm:$0xff]  ;;  %vm225_vm8 = vcmask 48128  }
  0x10   :  { %70 = vmatpush.msra.mxu0 %v46_v2  ;;  %v245_v12 = vld [vmem:[#allocation4] ss:$0 sm:$0xff]  ;;  %v246_v16 = vld [vmem:[#allocation4 + $0x1] ss:$0 sm:$0xff]  ;;  %151 = vmatpush.msra.mxu2 %v136_v22  ;;  %v133_v25 = vld [vmem:[#allocation4 + $0x70] sm:$0xff] }
  0x11   :  { %103 = vmatpush.msra.mxu1 %v82_v9  ;;  %v135_v23 = vld [vmem:[#allocation4 + $0x80] sm:$0xff]  ;;  %v132_v26 = vld [vmem:[#allocation4 + $0x68] sm:$0xff]  ;;  %v170_v41 = vld [vmem:[#allocation4 + $0xd8] sm:$0xff] }
  0x12   :  { %71 = vmatpush.msra.mxu0 %v45_v3  ;;  %152 = vmatpush.msra.mxu2 %v135_v23  ;;  %v131_v27 = vld [vmem:[#allocation4 + $0x60] sm:$0xff]  ;;  %v172_v39 = vld [vmem:[#allocation4 + $0xe8] sm:$0xff]  ;;  %v169_v42 = vld [vmem:[#allocation4 + $0xd0] sm:$0xff] }
  0x13   :  { %104 = vmatpush.msra.mxu1 %v81_v10  ;;  %v247_v28 = vld [vmem:[#allocation4 + $0x3] ss:$0 sm:$0xff]  ;;  %v248_v31 = vld [vmem:[#allocation4 + $0x2] ss:$0 sm:$0xff]  ;;  %187 = vmatpush.msra.mxu3 %v172_v39  ;;  %v168_v43 = vld [vmem:[#allocation4 + $0xc8] sm:$0xff] }
  0x14   :  { %72 = vmatpush.msra.mxu0 %v44_v4  ;;  %153 = vmatpush.msra.mxu2 %v134_v24  ;;  %v171_v40 = vld [vmem:[#allocation4 + $0xe0] sm:$0xff]  ;;  %v166_v45 = vld [vmem:[#allocation4 + $0xb8] sm:$0xff]  ;;  %v165_v46 = vld [vmem:[#allocation4 + $0xb0] sm:$0xff] }
  0x15   :  { %105 = vmatpush.msra.mxu1 %v80_v11  ;;  %188 = vmatpush.msra.mxu3 %v171_v40  ;;  %v167_v44 = vld [vmem:[#allocation4 + $0xc0] sm:$0xff]  ;;  %v164_v47 = vld [vmem:[#allocation4 + $0xa8] sm:$0xff]  ;;  %v162_v49 = vld [vmem:[#allocation4 + $0x98] sm:$0xff] }
  0x16   :  { %73 = vmatpush.msra.mxu0 %v43_v5  ;;  %154 = vmatpush.msra.mxu2 %v133_v25  ;;  %v163_v48 = vld [vmem:[#allocation4 + $0xa0] sm:$0xff]  ;;  %v161_v52 = vld [vmem:[#allocation4 + $0x90] sm:$0xff] }
  0x17   :  { %189 = vmatpush.msra.mxu3 %v170_v41  ;;  %v249_v53 = vld [vmem:[#allocation4 + $0x4] ss:$0 sm:$0xff] }
  0x18   :  { %74 = vmatpush.msra.mxu0 %v42_v6  ;;  %155 = vmatpush.msra.mxu2 %v132_v26 }
  0x19   :  { %234 = vmatmul.msk.f32.vlgmr.msra.gmra.mxu0 %vm51_vm1, %v41_v7  ;;  %190 = vmatpush.msra.mxu3 %v169_v42 }
  0x1a   :  { %156 = vmatpush.msra.mxu2 %v131_v27 }
  0x1b   :  { %191 = vmatpush.msra.mxu3 %v168_v43 }
  0x1d   :  { %192 = vmatpush.msra.mxu3 %v167_v44 }
  0x1f   :  { %193 = vmatpush.msra.mxu3 %v166_v45 }
  0x21   :  { %194 = vmatpush.msra.mxu3 %v165_v46 }
  0x23   :  { %195 = vmatpush.msra.mxu3 %v164_v47 }
  0x25   :  { %196 = vmatpush.msra.mxu3 %v163_v48 }
  0x27   :  { %197 = vmatpush.msra.mxu3 %v162_v49 }
  0x29   :  { %198 = vmatpush.msra.mxu3 %v161_v52 }
  0x96   :  { %v76_v13 = vpop.f32.mrf.mxu0 }
  0x97   :  { %v77_v14 = vadd.f32 %v245_v12, %v76_v13 }
  0x99   :  { %250 = vtanh.f32 %v77_v14 }
  0x9f   :  { %v251_v15 = vpop.eup %250 }
  0xa0   :  { %235 = vmatmul.msk.f32.vlgmr.msra.gmra.mxu1 %vm86_vm2, %v251_v15 }
 0x11d   :  { %v107_v17 = vpop.f32.mrf.mxu1 }
 0x11e   :  { %v108_v18 = vadd.f32 %v246_v16, %v107_v17 }
 0x120   :  { %v110_v19 = vmul.f32 %v108_v18, %v108_v18  ;;  %v121_v21 = vmul.f32 2.0, %v108_v18 }
 0x122   :  { %v112_v20 = vsel %vm111_vm3, %v110_v19, 0.0 }
 0x123   :  { %113 = vadd.xlane.f32.xlu0 %v112_v20 }
 0x137   :  { %123 = vrot.lane.b32.xlu0 %v121_v21, %s312_s0 }
 0x196   :  { %v114_v29 = vpop.xlane.xlu0 %113 }
 0x197   :  { %v118_v30 = vmul.f32 %v247_v28, %v114_v29 }
 0x199   :  { %v120_v32 = vadd.f32 %v248_v31, %v118_v30 }
 0x1a9   :  { %v124_v33 = vpop.permute.xlu0 %123 }
 0x1aa   :  { %v126_v34 = vsub.f32 %v120_v32, %v124_v33 }
 0x1ac   :  { %v127_v35 = vmax.f32 %v126_v34, 0.0 }
 0x1ae   :  { %v128_v36 = vmul.f32 -0.5, %v127_v35 }
 0x1b0   :  { %v129_v37 = vmul.f32 1.442695, %v128_v36 }
 0x1b2   :  { %252 = vpow2.f32 %v129_v37 }
 0x1b8   :  { %v253_v38 = vpop.eup %252 }
 0x1b9   :  { %236 = vmatmul.msk.f32.vlgmr.msra.gmra.mxu2 %vm137_vm4, %v253_v38 }
 0x23c   :  { %v158_v50 = vpop.f32.mrf.mxu2 }
 0x23d   :  { %v173_v51 = vmul.f32 %v253_v38, %v158_v50 }
 0x23f   :  { %175 = vrot.lane.b32.xlu1 %v173_v51, %s313_s1 }
 0x247   :  { %206 = vrot.lane.b32.xlu1 %v249_v53, %s314_s21 }
 0x2b1   :  { %v176_v54 = vpop.permute.xlu1 %175 }
 0x2b2   :  { %v178_v55 = vsel %vm137_vm4, %v253_v38, %v176_v54 }
 0x2b3   :  { %237 = vmatmul.msk.f32.vlgmr.msra.gmra.mxu3 %vm179_vm5, %v178_v55 }
 0x2b9   :  { %v207_v56 = vpop.permute.xlu1 %206 }
 0x336   :  { %v200_v57 = vpop.f32.mrf.mxu3 }
 0x337   :  { %v209_v58 = vadd.f32 %v207_v56, %v200_v57 }
 0x339   :  { %v210_v59 = vmax.f32 %v209_v58, 1e-12 }
 0x33b   :  { %254 = vrsqrt.f32 %v210_v59  ;;  %vm218_vm7 = vcmp.eq.f32.partialorder %v210_v59, inf  ;;  %v221_v3 = vand.u32 2147483648, %v210_v59  ;;  %vm220_vm9 = vcmp.eq.f32.partialorder %v210_v59, 0.0 }
 0x341   :  { %v255_v60 = vpop.eup %254 }
 0x342   :  { %v212_v61 = vmul.f32 %v255_v60, %v210_v59 }
 0x344   :  { %v213_v62 = vmul.f32 %v255_v60, %v212_v61 }
 0x346   :  { %v214_v63 = vmul.f32 0.5, %v213_v62 }
 0x348   :  { %v215_v0 = vsub.f32 1.5, %v214_v63 }
 0x34a   :  { %v216_v1 = vmul.f32 %v255_v60, %v215_v0 }
 0x34c   :  { %v217_v2 = vmul.f32 %v216_v1, %v210_v59 }
 0x34e   :  { %v219_v4 = vsel %vm218_vm7, %v210_v59, %v217_v2 }
 0x34f   :  { %v222_v5 = vsel %vm220_vm9, %v221_v3, %v219_v4 }
 0x350   :  { %v224_v6 = vsel %vm223_vm6, %v200_v57, %v222_v5 }
 0x351   :  { %226 = vst.msk [vmem:[%s343_s2] sm:$0xff] %vm225_vm8, %v224_v6 }
 0x352   :  { %231 = vsyncpa [#allocation3], 1 }
 0x353   :  { %232 = vsyncpa [#allocation5], 1 }

</bundles_post_ra>
